<compile_context>
chip_gen: v7x
topology: tpu7x:2x2x1
jax: 0.10.0
libtpu: 0.0.40
codegen_flags: <defaults>
</compile_context>

<pallas_src>
import jax
import jax.numpy as jnp
from jax.experimental import pallas as pl
from jax.experimental.pallas import tpu as pltpu

HIDDEN = 128
LANE = 128  # TPU lane width; batch tiles are kept multiples of this.


def _round_up(n, m):
    return ((n + m - 1) // m) * m


def _vmem_limit_bytes():
    """Generation-aware scoped-VMEM limit (~75% of physical, capped at 96 MiB)."""
    try:
        cap = pltpu.get_tpu_info().vmem_capacity_bytes
        return int(min(cap * 3 // 4, 96 * 1024 * 1024))
    except Exception:
        # Safe on every generation (v7x has 64 MiB physical per TensorCore).
        return 48 * 1024 * 1024


def _choose_tile(n, tile_m):
    """Pick a lane-dense batch tile (multiple of 128) that balances the grid.

    - caps the tile at tile_m,
    - forces >= 2 grid steps when there is enough work (so both v7x
      TensorCores are used via the "parallel" grid axis),
    - sizes the tile to ~cdiv(n, steps) so awkward N is not padded massively.
    """
    tile_m = max(LANE, _round_up(tile_m, LANE))
    n_lane = _round_up(max(n, 1), LANE)
    steps = pl.cdiv(n_lane, tile_m)
    if steps == 1 and n_lane >= 2 * LANE:
        steps = 2
    return _round_up(pl.cdiv(n_lane, steps), LANE)


def mlp_kernel(xt_ref, w1_ref, b1_ref, w2_ref, b2_ref,
               w3_ref, b3_ref, w4_ref, b4_ref, ot_ref):
    # Feature-major tiles: xt is (3, TM); all activations are (features, TM),
    # so every matmul output is lane-dense along the batch tile.
    xt = xt_ref[...].astype(jnp.bfloat16)                      # (3, TM)

    # Layer 1: (128, 3) @ (3, TM) on the MXU, bf16 inputs, f32 accumulation.
    h = jnp.dot(w1_ref[...], xt,
                preferred_element_type=jnp.float32) + b1_ref[...]
    h = jnp.maximum(h, 0.0)                                    # f32 VPU

    # Layer 2: (128, 128) @ (128, TM)
    h = jnp.dot(w2_ref[...], h.astype(jnp.bfloat16),
                preferred_element_type=jnp.float32) + b2_ref[...]
    h = jnp.maximum(h, 0.0)

    # Layer 3: (128, 128) @ (128, TM)
    h = jnp.dot(w3_ref[...], h.astype(jnp.bfloat16),
                preferred_element_type=jnp.float32) + b3_ref[...]
    h = jnp.maximum(h, 0.0)

    # Layer 4: (2, 128) @ (128, TM), bf16 MXU, lane-dense (2, TM) output.
    out = jnp.dot(w4_ref[...], h.astype(jnp.bfloat16),
                  preferred_element_type=jnp.float32) + b4_ref[...]
    ot_ref[...] = out.astype(ot_ref.dtype)


def fully_connected_forward(x, params, *, tile_m=2048):
    """x: (N, 3) float32.  params: dict of f32 weights/biases.  Returns (N, 2)."""
    n = x.shape[0]
    tm = _choose_tile(n, tile_m)
    n_pad = _round_up(max(n, 1), tm)

    # Feature-major (transposed) input; pad the batch (last) dim.
    xt = jnp.transpose(x)                                      # (3, N)
    if n_pad != n:
        xt = jnp.pad(xt, ((0, 0), (0, n_pad - n)))

    # Pre-transposed weights; MXU operands in bf16, biases stay f32 columns.
    w1t = jnp.transpose(params["w1"]).astype(jnp.bfloat16)     # (128, 3)
    w2t = jnp.transpose(params["w2"]).astype(jnp.bfloat16)     # (128, 128)
    w3t = jnp.transpose(params["w3"]).astype(jnp.bfloat16)     # (128, 128)
    w4t = jnp.transpose(params["w4"]).astype(jnp.bfloat16)     # (2, 128)
    b1t = jnp.transpose(params["b1"])                          # (128, 1)
    b2t = jnp.transpose(params["b2"])                          # (128, 1)
    b3t = jnp.transpose(params["b3"])                          # (128, 1)
    b4t = jnp.transpose(params["b4"])                          # (2, 1)

    # Constant block index -> weights DMA'd once, VMEM-resident across steps.
    def const_spec(shape):
        return pl.BlockSpec(shape, lambda i: (0, 0))

    grid = (n_pad // tm,)

    out_t = pl.pallas_call(
        mlp_kernel,
        out_shape=jax.ShapeDtypeStruct((2, n_pad), jnp.float32),
        grid=grid,
        in_specs=[
            pl.BlockSpec((3, tm), lambda i: (0, i)),           # x^T tile
            const_spec((HIDDEN, 3)),                           # w1^T (bf16)
            const_spec((HIDDEN, 1)),                           # b1
            const_spec((HIDDEN, HIDDEN)),                      # w2^T (bf16)
            const_spec((HIDDEN, 1)),                           # b2
            const_spec((HIDDEN, HIDDEN)),                      # w3^T (bf16)
            const_spec((HIDDEN, 1)),                           # b3
            const_spec((2, HIDDEN)),                           # w4^T (bf16)
            const_spec((2, 1)),                                # b4
        ],
        out_specs=pl.BlockSpec((2, tm), lambda i: (0, i)),     # out^T tile
        compiler_params=pltpu.CompilerParams(
            dimension_semantics=("parallel",),
            vmem_limit_bytes=_vmem_limit_bytes(),
        ),
    )(xt, w1t, b1t, w2t, b2t, w3t, b3t, w4t, b4t)

    # Cheap wrapper-side un-transpose + unpad (layout plumbing, not compute).
    return jnp.transpose(out_t)[:n]


def init_params(key):
    """Deterministic init mirroring nn.Linear's U(-1/sqrt(fan_in), +1/sqrt(fan_in))."""
    dims = [(3, HIDDEN), (HIDDEN, HIDDEN), (HIDDEN, HIDDEN), (HIDDEN, 2)]
    params = {}
    for i, (fan_in, fan_out) in enumerate(dims, start=1):
        key, kw, kb = jax.random.split(key, 3)
        bound = 1.0 / jnp.sqrt(fan_in)
        # Stored as (in, out) so references compute x @ W; the wrapper
        # transposes once for the feature-major kernel layout.
        params[f"w{i}"] = jax.random.uniform(
            kw, (fan_in, fan_out), jnp.float32, minval=-bound, maxval=bound)
        params[f"b{i}"] = jax.random.uniform(
            kb, (1, fan_out), jnp.float32, minval=-bound, maxval=bound)
    return params


def _ref_forward(x, params, *, mxu_bf16):
    """Pure-JAX reference; mxu_bf16=True mirrors the kernel's MXU precision."""
    def dot(a, b):
        if mxu_bf16:
            return jnp.dot(a.astype(jnp.bfloat16), b.astype(jnp.bfloat16),
                           preferred_element_type=jnp.float32)
        return jnp.dot(a, b)

    h = jnp.maximum(dot(x, params["w1"]) + params["b1"], 0.0)
    h = jnp.maximum(dot(h, params["w2"]) + params["b2"], 0.0)
    h = jnp.maximum(dot(h, params["w3"]) + params["b3"], 0.0)
    return dot(h, params["w4"]) + params["b4"]


if __name__ == "__main__":
    key = jax.random.PRNGKey(0)
    key, kx1, kx2 = jax.random.split(key, 3)
    params = init_params(key)

    # Case 1: tiny batch (single 128-wide tile, grid of 1).
    x_small = jax.random.normal(kx1, (8, 3), jnp.float32)
    out_small = jax.block_until_ready(fully_connected_forward(x_small, params))
    assert out_small.shape == (8, 2), out_small.shape

    ref_bf = _ref_forward(x_small, params, mxu_bf16=True)
    ref_f32 = _ref_forward(x_small, params, mxu_bf16=False)
    assert jnp.allclose(out_small, ref_bf, atol=2e-3, rtol=1e-2), "mismatch vs bf16 ref"
    assert jnp.allclose(out_small, ref_f32, atol=5e-2, rtol=5e-2), "mismatch vs f32 ref"

    # Case 2: batch not divisible by the tile (exercises the forced 2-step
    # grid, batch padding, and the balanced-tile selection: 600 -> 2 x 384).
    x_big = jax.random.normal(kx2, (600, 3), jnp.float32)
    out_big = jax.block_until_ready(fully_connected_forward(x_big, params))
    assert out_big.shape == (600, 2), out_big.shape

    ref_bf_big = _ref_forward(x_big, params, mxu_bf16=True)
    ref_f32_big = _ref_forward(x_big, params, mxu_bf16=False)
    assert jnp.allclose(out_big, ref_bf_big, atol=2e-3, rtol=1e-2), "mismatch vs bf16 ref"
    assert jnp.allclose(out_big, ref_f32_big, atol=5e-2, rtol=5e-2), "mismatch vs f32 ref"

    print("KERNEL_OK")
</pallas_src>

<mosaic_0001>
module attributes {stable_mosaic.version = 11 : i64} {
  func.func @mlp_kernel(%arg0: i32, %arg1: memref<3x128xf32, #tpu.memory_space<vmem>>, %arg2: memref<128x3xbf16, #tpu.memory_space<vmem>>, %arg3: memref<128x1xf32, #tpu.memory_space<vmem>>, %arg4: memref<128x128xbf16, #tpu.memory_space<vmem>>, %arg5: memref<128x1xf32, #tpu.memory_space<vmem>>, %arg6: memref<128x128xbf16, #tpu.memory_space<vmem>>, %arg7: memref<128x1xf32, #tpu.memory_space<vmem>>, %arg8: memref<2x128xbf16, #tpu.memory_space<vmem>>, %arg9: memref<2x1xf32, #tpu.memory_space<vmem>>, %arg10: memref<2x128xf32, #tpu.memory_space<vmem>>) attributes {dimension_semantics = [#tpu.dimension_semantics<parallel>], iteration_bounds = array<i64: 1>, scalar_prefetch = 0 : i64, scratch_operands = 0 : i64, tpu.core_type = #tpu.core_type<tc>, window_params = [{transform_indices = @transform_0, window_bounds = array<i64: 3, 128>}, {pipeline_mode = #tpu.pipeline_mode<synchronous>, transform_indices = @transform_1, window_bounds = array<i64: 128, 3>}, {pipeline_mode = #tpu.pipeline_mode<synchronous>, transform_indices = @transform_2, window_bounds = array<i64: 128, 1>}, {pipeline_mode = #tpu.pipeline_mode<synchronous>, transform_indices = @transform_3, window_bounds = array<i64: 128, 128>}, {pipeline_mode = #tpu.pipeline_mode<synchronous>, transform_indices = @transform_4, window_bounds = array<i64: 128, 1>}, {pipeline_mode = #tpu.pipeline_mode<synchronous>, transform_indices = @transform_5, window_bounds = array<i64: 128, 128>}, {pipeline_mode = #tpu.pipeline_mode<synchronous>, transform_indices = @transform_6, window_bounds = array<i64: 128, 1>}, {pipeline_mode = #tpu.pipeline_mode<synchronous>, transform_indices = @transform_7, window_bounds = array<i64: 2, 128>}, {pipeline_mode = #tpu.pipeline_mode<synchronous>, transform_indices = @transform_8, window_bounds = array<i64: 2, 1>}, {transform_indices = @transform_9, window_bounds = array<i64: 2, 128>}]} {
    %c0 = arith.constant 0 : index
    %c0_0 = arith.constant 0 : index
    %0 = vector.load %arg1[%c0, %c0_0] : memref<3x128xf32, #tpu.memory_space<vmem>>, vector<3x128xf32>
    %1 = arith.truncf %0 : vector<3x128xf32> to vector<3x128xbf16>
    %c0_1 = arith.constant 0 : index
    %c0_2 = arith.constant 0 : index
    %2 = vector.load %arg2[%c0_1, %c0_2] : memref<128x3xbf16, #tpu.memory_space<vmem>>, vector<128x3xbf16>
    %cst = arith.constant dense<0.000000e+00> : vector<128x128xf32>
    %3 = tpu.matmul %2, %1, %cst {dimension_numbers = #tpu.dot_dimension_numbers<[1], [0], [0], [1], [0, 0, 1, 1], [], []>} : vector<128x3xbf16>, vector<3x128xbf16>, vector<128x128xf32> -> vector<128x128xf32>
    %c0_3 = arith.constant 0 : index
    %c0_4 = arith.constant 0 : index
    %4 = vector.load %arg3[%c0_3, %c0_4] : memref<128x1xf32, #tpu.memory_space<vmem>>, vector<128x1xf32>
    %5 = vector.broadcast %4 : vector<128x1xf32> to vector<128x128xf32>
    %6 = arith.addf %3, %5 : vector<128x128xf32>
    %cst_5 = arith.constant 0.000000e+00 : f32
    %7 = vector.broadcast %cst_5 : f32 to vector<128x128xf32>
    %8 = arith.maximumf %6, %7 : vector<128x128xf32>
    %c0_6 = arith.constant 0 : index
    %c0_7 = arith.constant 0 : index
    %9 = vector.load %arg4[%c0_6, %c0_7] : memref<128x128xbf16, #tpu.memory_space<vmem>>, vector<128x128xbf16>
    %10 = arith.truncf %8 : vector<128x128xf32> to vector<128x128xbf16>
    %cst_8 = arith.constant dense<0.000000e+00> : vector<128x128xf32>
    %11 = tpu.matmul %9, %10, %cst_8 {dimension_numbers = #tpu.dot_dimension_numbers<[1], [0], [0], [1], [0, 0, 1, 1], [], []>} : vector<128x128xbf16>, vector<128x128xbf16>, vector<128x128xf32> -> vector<128x128xf32>
    %c0_9 = arith.constant 0 : index
    %c0_10 = arith.constant 0 : index
    %12 = vector.load %arg5[%c0_9, %c0_10] : memref<128x1xf32, #tpu.memory_space<vmem>>, vector<128x1xf32>
    %13 = vector.broadcast %12 : vector<128x1xf32> to vector<128x128xf32>
    %14 = arith.addf %11, %13 : vector<128x128xf32>
    %cst_11 = arith.constant 0.000000e+00 : f32
    %15 = vector.broadcast %cst_11 : f32 to vector<128x128xf32>
    %16 = arith.maximumf %14, %15 : vector<128x128xf32>
    %c0_12 = arith.constant 0 : index
    %c0_13 = arith.constant 0 : index
    %17 = vector.load %arg6[%c0_12, %c0_13] : memref<128x128xbf16, #tpu.memory_space<vmem>>, vector<128x128xbf16>
    %18 = arith.truncf %16 : vector<128x128xf32> to vector<128x128xbf16>
    %cst_14 = arith.constant dense<0.000000e+00> : vector<128x128xf32>
    %19 = tpu.matmul %17, %18, %cst_14 {dimension_numbers = #tpu.dot_dimension_numbers<[1], [0], [0], [1], [0, 0, 1, 1], [], []>} : vector<128x128xbf16>, vector<128x128xbf16>, vector<128x128xf32> -> vector<128x128xf32>
    %c0_15 = arith.constant 0 : index
    %c0_16 = arith.constant 0 : index
    %20 = vector.load %arg7[%c0_15, %c0_16] : memref<128x1xf32, #tpu.memory_space<vmem>>, vector<128x1xf32>
    %21 = vector.broadcast %20 : vector<128x1xf32> to vector<128x128xf32>
    %22 = arith.addf %19, %21 : vector<128x128xf32>
    %cst_17 = arith.constant 0.000000e+00 : f32
    %23 = vector.broadcast %cst_17 : f32 to vector<128x128xf32>
    %24 = arith.maximumf %22, %23 : vector<128x128xf32>
    %c0_18 = arith.constant 0 : index
    %c0_19 = arith.constant 0 : index
    %25 = vector.load %arg8[%c0_18, %c0_19] : memref<2x128xbf16, #tpu.memory_space<vmem>>, vector<2x128xbf16>
    %26 = arith.truncf %24 : vector<128x128xf32> to vector<128x128xbf16>
    %cst_20 = arith.constant dense<0.000000e+00> : vector<2x128xf32>
    %27 = tpu.matmul %25, %26, %cst_20 {dimension_numbers = #tpu.dot_dimension_numbers<[1], [0], [0], [1], [0, 0, 1, 1], [], []>} : vector<2x128xbf16>, vector<128x128xbf16>, vector<2x128xf32> -> vector<2x128xf32>
    %c0_21 = arith.constant 0 : index
    %c0_22 = arith.constant 0 : index
    %28 = vector.load %arg9[%c0_21, %c0_22] : memref<2x1xf32, #tpu.memory_space<vmem>>, vector<2x1xf32>
    %29 = vector.broadcast %28 : vector<2x1xf32> to vector<2x128xf32>
    %30 = arith.addf %27, %29 : vector<2x128xf32>
    %c0_23 = arith.constant 0 : index
    %c0_24 = arith.constant 0 : index
    %31 = vector.load %arg10[%c0_23, %c0_24] : memref<2x128xf32, #tpu.memory_space<vmem>>, vector<2x128xf32>
    tpu.vector_store %arg10[%c0_23, %c0_24], %30 {strides = array<i32>} : memref<2x128xf32, #tpu.memory_space<vmem>>, vector<2x128xf32>,
    return
  }
  func.func @transform_0(%arg0: i32) -> (i32, i32) {
    %c0_i32 = arith.constant 0 : i32
    %c0_i32_0 = arith.constant 0 : i32
    return %c0_i32, %arg0 : i32, i32
  }
  func.func @transform_1(%arg0: i32) -> (i32, i32) {
    %c0_i32 = arith.constant 0 : i32
    %c0_i32_0 = arith.constant 0 : i32
    %c0_i32_1 = arith.constant 0 : i32
    return %c0_i32, %c0_i32_0 : i32, i32
  }
  func.func @transform_2(%arg0: i32) -> (i32, i32) {
    %c0_i32 = arith.constant 0 : i32
    %c0_i32_0 = arith.constant 0 : i32
    %c0_i32_1 = arith.constant 0 : i32
    return %c0_i32, %c0_i32_0 : i32, i32
  }
  func.func @transform_3(%arg0: i32) -> (i32, i32) {
    %c0_i32 = arith.constant 0 : i32
    %c0_i32_0 = arith.constant 0 : i32
    %c0_i32_1 = arith.constant 0 : i32
    return %c0_i32, %c0_i32_0 : i32, i32
  }
  func.func @transform_4(%arg0: i32) -> (i32, i32) {
    %c0_i32 = arith.constant 0 : i32
    %c0_i32_0 = arith.constant 0 : i32
    %c0_i32_1 = arith.constant 0 : i32
    return %c0_i32, %c0_i32_0 : i32, i32
  }
  func.func @transform_5(%arg0: i32) -> (i32, i32) {
    %c0_i32 = arith.constant 0 : i32
    %c0_i32_0 = arith.constant 0 : i32
    %c0_i32_1 = arith.constant 0 : i32
    return %c0_i32, %c0_i32_0 : i32, i32
  }
  func.func @transform_6(%arg0: i32) -> (i32, i32) {
    %c0_i32 = arith.constant 0 : i32
    %c0_i32_0 = arith.constant 0 : i32
    %c0_i32_1 = arith.constant 0 : i32
    return %c0_i32, %c0_i32_0 : i32, i32
  }
  func.func @transform_7(%arg0: i32) -> (i32, i32) {
    %c0_i32 = arith.constant 0 : i32
    %c0_i32_0 = arith.constant 0 : i32
    %c0_i32_1 = arith.constant 0 : i32
    return %c0_i32, %c0_i32_0 : i32, i32
  }
  func.func @transform_8(%arg0: i32) -> (i32, i32) {
    %c0_i32 = arith.constant 0 : i32
    %c0_i32_0 = arith.constant 0 : i32
    %c0_i32_1 = arith.constant 0 : i32
    return %c0_i32, %c0_i32_0 : i32, i32
  }
  func.func @transform_9(%arg0: i32) -> (i32, i32) {
    %c0_i32 = arith.constant 0 : i32
    %c0_i32_0 = arith.constant 0 : i32
    return %c0_i32, %arg0 : i32, i32
  }
}

</mosaic_0001>

<bundles_post_ra>
// kernel: tpu_custom_call.1
= control target key start
LH: loop header
LB: loop body
LE: loop exit
PB: predicated region body
PF: predicated region fallthrough
CT: control target
= control target key end

     0   :  { %vm213_vm0 = vcmask 1040384   ;;  %v1204_v3 = vmov 0   ;;  %vm214_vm1 = vcmask 1041408   ;;  %v1205_v5 = vmov 65535   ;;  %s1513_s0 = inlined_call_operand.vmem [shape: f32[3,128], index: 0, kind: input, shape index: {}]   ;;  %s1514_s1 = inlined_call_operand.vmem [shape: bf16[128,3], index: 1, kind: input, shape index: {}]   ;;  %s1515_s2 = inlined_call_operand.vmem [shape: f32[128,1], index: 2, kind: input, shape index: {}]   ;;  %s1516_s3 = inlined_call_operand.vmem [shape: bf16[128,128], index: 3, kind: input, shape index: {}]   ;;  %s1517_s4 = inlined_call_operand.vmem [shape: f32[128,1], index: 4, kind: input, shape index: {}]   ;;  %s1518_s5 = inlined_call_operand.vmem [shape: bf16[128,128], index: 5, kind: input, shape index: {}]   ;;  %s1519_s6 = inlined_call_operand.vmem [shape: f32[128,1], index: 6, kind: input, shape index: {}]   ;;  %s1520_s7 = inlined_call_operand.vmem [shape: bf16[2,128], index: 7, kind: input, shape index: {}]   ;;  %s1521_s8 = inlined_call_operand.vmem [shape: f32[2,1], index: 8, kind: input, shape index: {}]   ;;  %s1522_s9 = inlined_call_operand.hbm [shape: f32[2,128], index: 9, kind: output, shape index: {}]  }
   0x1   :  { %v52_v0 = vld [vmem:[%s1515_s2] sm:$0xff]  ;;  %v54_v1 = vld [vmem:[%s1515_s2 + $0x10] sm:$0xff]  ;;  %1154 = vset.pattern.permute.xlu0 %v1204_v3  ;;  %1155 = vset.pattern.permute.xlu1 %v1204_v3  ;;  %v215_v6 = vsel %vm213_vm0, 4294967295, %v1205_v5  ;;  %vm188_vm2 = vcmask 23552   ;;  %v53_v9 = vld [vmem:[%s1515_s2 + $0x8] sm:$0xff] }
   0x2   :  { %v34_v2 = vld [vmem:[%s1513_s0] sm:$0x7]  ;;  %70 = vperm.xlu0 %1154, %v52_v0   ;;  %80 = vperm.xlu1 %1155, %v54_v1   ;;  %v216_v8 = vsel %vm214_vm1, %v215_v6, 0  ;;  %v55_v11 = vld [vmem:[%s1515_s2 + $0x18] sm:$0xff]  ;;  %v1157_v12 = vld [vmem:[%s1514_s1 + $0x8] sm:$0xff]  }
   0x3   :  { %v35_v4 = vpack.c.bf16 %v34_v2, %v34_v2  ;;  %v1156_v7 = vld [vmem:[%s1514_s1] sm:$0xff]   ;;  %v1158_v14 = vld [vmem:[%s1514_s1 + $0x10] sm:$0xff]   ;;  %v57_v15 = vld [vmem:[%s1515_s2 + $0x28] sm:$0xff] }
   0x4   :  { %1049 = vmatprep.mubr.msk.bf16.mxu0 %vm188_vm2, %v1156_v7  ;;  %v56_v13 = vld [vmem:[%s1515_s2 + $0x20] sm:$0xff]  ;;  %v58_v16 = vld [vmem:[%s1515_s2 + $0x30] sm:$0xff]  ;;  %v59_v17 = vld [vmem:[%s1515_s2 + $0x38] sm:$0xff] }
   0x5   :  { %v218_v10 = vand.u32 %v216_v8, %v35_v4  ;;  %v1159_v18 = vld [vmem:[%s1514_s1 + $0x18] sm:$0xff]   ;;  %v60_v19 = vld [vmem:[%s1515_s2 + $0x40] sm:$0xff]  ;;  %v61_v21 = vld [vmem:[%s1515_s2 + $0x48] sm:$0xff] }
   0x6   :  { %75 = vperm.xlu0 %1154, %v53_v9   ;;  %85 = vperm.xlu1 %1155, %v55_v11   ;;  %v1160_v20 = vld [vmem:[%s1514_s1 + $0x20] sm:$0xff]   ;;  %v62_v22 = vld [vmem:[%s1515_s2 + $0x50] sm:$0xff]  ;;  %v63_v23 = vld [vmem:[%s1515_s2 + $0x58] sm:$0xff] }
   0x7   :  { %1047 = vmatprep.subr.bf16.mxu0 %v218_v10  ;;  %v1161_v24 = vld [vmem:[%s1514_s1 + $0x28] sm:$0xff]   ;;  %v64_v25 = vld [vmem:[%s1515_s2 + $0x60] sm:$0xff]  ;;  %v1162_v26 = vld [vmem:[%s1514_s1 + $0x30] sm:$0xff]  }
   0x8   :  { %1048 = vmatpush3.bf16.msra.mxu0 %v218_v10  ;;  %v65_v27 = vld [vmem:[%s1515_s2 + $0x68] sm:$0xff]  ;;  %v66_v28 = vld [vmem:[%s1515_s2 + $0x70] sm:$0xff]  ;;  %v67_v29 = vld [vmem:[%s1515_s2 + $0x78] sm:$0xff] }
   0x9   :  { %v1163_v30 = vld [vmem:[%s1514_s1 + $0x38] sm:$0xff]   ;;  %v357_v31 = vld [vmem:[%s1517_s4] sm:$0xff]  ;;  %v358_v32 = vld [vmem:[%s1517_s4 + $0x8] sm:$0xff] }
   0xa   :  { %90 = vperm.xlu0 %1154, %v56_v13   ;;  %95 = vperm.xlu1 %1155, %v57_v15   ;;  %v359_v33 = vld [vmem:[%s1517_s4 + $0x10] sm:$0xff] }
   0xb   :  { %1050 = vmatmul.mubr.msk.bf16.vlgmr.msra.gmra.mrb[0].mxu0 %vm188_vm2, %v1157_v12 }
   0xc   :  { %1053 = vmatprep.mubr.msk.bf16.mxu0 %vm188_vm2, %v1158_v14 }
   0xe   :  { %100 = vperm.xlu0 %1154, %v58_v16   ;;  %105 = vperm.xlu1 %1155, %v59_v17  }
  0x12   :  { %110 = vperm.xlu0 %1154, %v60_v19   ;;  %115 = vperm.xlu1 %1155, %v61_v21  }
  0x13   :  { %1054 = vmatmul.mubr.msk.bf16.gmra.mrb[4].mxu0 %vm188_vm2, %v1159_v18 }
  0x14   :  { %1057 = vmatprep.mubr.msk.bf16.mxu0 %vm188_vm2, %v1160_v20 }
  0x16   :  { %120 = vperm.xlu0 %1154, %v62_v22   ;;  %125 = vperm.xlu1 %1155, %v63_v23  }
  0x1a   :  { %130 = vperm.xlu0 %1154, %v64_v25   ;;  %135 = vperm.xlu1 %1155, %v65_v27  }
  0x1b   :  { %1058 = vmatmul.mubr.msk.bf16.gmra.mrb[8].mxu0 %vm188_vm2, %v1161_v24 }
  0x1c   :  { %1061 = vmatprep.mubr.msk.bf16.mxu0 %vm188_vm2, %v1162_v26 }
  0x1e   :  { %140 = vperm.xlu0 %1154, %v66_v28   ;;  %145 = vperm.xlu1 %1155, %v67_v29  }
  0x22   :  { %375 = vperm.xlu0 %1154, %v357_v31   ;;  %380 = vperm.xlu1 %1155, %v358_v32  }
  0x23   :  { %1062 = vmatmul.mubr.msk.bf16.gmra.mrb[12].mxu0 %vm188_vm2, %v1163_v30 }
  0x24   :  { %14 = vsyncpa [#allocation3], 0  ;;  %v360_v34 = vld [vmem:[%s1517_s4 + $0x18] sm:$0xff]  ;;  %v361_v35 = vld [vmem:[%s1517_s4 + $0x20] sm:$0xff]  ;;  %vm1207_vm3 = vmmov 0   ;;  %s1208_s10 = smov [#allocation2]  }
  0x25   :  { %v362_v36 = vld [vmem:[%s1517_s4 + $0x28] sm:$0xff]  ;;  %v363_v37 = vld [vmem:[%s1517_s4 + $0x30] sm:$0xff]  ;;  %v364_v38 = vld [vmem:[%s1517_s4 + $0x38] sm:$0xff]  ;;  %s957_s11 = sshll.u32 %s1208_s10, 4  ;;  %s958_s11 = int_to_ptr.vmem [resolvable:$true] %s957_s11 }
  0x26   :  { %385 = vperm.xlu0 %1154, %v359_v33   ;;  %390 = vperm.xlu1 %1155, %v360_v34   ;;  %v365_v39 = vld [vmem:[%s1517_s4 + $0x40] sm:$0xff]  ;;  %v366_v40 = vld [vmem:[%s1517_s4 + $0x48] sm:$0xff]  ;;  %v367_v41 = vld [vmem:[%s1517_s4 + $0x50] sm:$0xff]  ;;  %s1180_s12 = scalar_lea.vmem %s958_s11, 32  ;;  %p1185_p1 = scmp.lt.s32.totalorder %s958_s11, %s958_s11 }
  0x27   :  { %v368_v42 = vld [vmem:[%s1517_s4 + $0x58] sm:$0xff]  ;;  %v369_v43 = vld [vmem:[%s1517_s4 + $0x60] sm:$0xff]  ;;  %v370_v44 = vld [vmem:[%s1517_s4 + $0x68] sm:$0xff]  ;;  %p1181_p0 = scmp.ne.s32.totalorder %s958_s11, %s1180_s12  ;;  %p1186_p2 = scmp.lt.s32.totalorder %s1180_s12, %s1180_s12 }
  0x28   :  { %v371_v45 = vld [vmem:[%s1517_s4 + $0x70] sm:$0xff]  ;;  %v372_v46 = vld [vmem:[%s1517_s4 + $0x78] sm:$0xff]  ;;  %v638_v47 = vld [vmem:[%s1519_s6] sm:$0xff] }
  0x29   :  { %v639_v48 = vld [vmem:[%s1519_s6 + $0x8] sm:$0xff]  ;;  %v640_v49 = vld [vmem:[%s1519_s6 + $0x10] sm:$0xff]  ;;  %v641_v50 = vld [vmem:[%s1519_s6 + $0x18] sm:$0xff]  ;;  %p1187_p3 = por %p1186_p2, %p1185_p1 }
  0x2a   :  { %395 = vperm.xlu0 %1154, %v361_v35   ;;  %400 = vperm.xlu1 %1155, %v362_v36   ;;  %v642_v51 = vld [vmem:[%s1519_s6 + $0x20] sm:$0xff]  ;;  %v643_v52 = vld [vmem:[%s1519_s6 + $0x28] sm:$0xff]  ;;  %v644_v53 = vld [vmem:[%s1519_s6 + $0x30] sm:$0xff] }
  0x2b   :  { %v645_v54 = vld [vmem:[%s1519_s6 + $0x38] sm:$0xff]  ;;  %v646_v55 = vld [vmem:[%s1519_s6 + $0x40] sm:$0xff]  ;;  %v647_v56 = vld [vmem:[%s1519_s6 + $0x48] sm:$0xff]  ;;  %p1188_p4 = pnand %p1187_p3, %p1181_p0 }
  0x2c   :  { %v648_v57 = vld [vmem:[%s1519_s6 + $0x50] sm:$0xff]  ;;  %v649_v58 = vld [vmem:[%s1519_s6 + $0x58] sm:$0xff]  ;;  %v650_v59 = vld [vmem:[%s1519_s6 + $0x60] sm:$0xff] }
  0x2d   :  { %v651_v60 = vld [vmem:[%s1519_s6 + $0x68] sm:$0xff]  ;;  %v652_v61 = vld [vmem:[%s1519_s6 + $0x70] sm:$0xff]  ;;  %v653_v62 = vld [vmem:[%s1519_s6 + $0x78] sm:$0xff] }
  0x2e   :  { %405 = vperm.xlu0 %1154, %v363_v37   ;;  %410 = vperm.xlu1 %1155, %v364_v38   ;;  %v904_v63 = vld [vmem:[%s1521_s8] sm:$0x3] }
  0x2f   :  { %v1164_v0 = vld [vmem:[%s1516_s3] sm:$0xff]  }
  0x30   :  { %1081 = vmatprep.mubr.bf16.mxu1 %v1164_v0 }
  0x32   :  { %415 = vperm.xlu0 %1154, %v365_v39   ;;  %420 = vperm.xlu1 %1155, %v366_v40  }
  0x36   :  { %425 = vperm.xlu0 %1154, %v367_v41   ;;  %430 = vperm.xlu1 %1155, %v368_v42  }
  0x3a   :  { %435 = vperm.xlu0 %1154, %v369_v43   ;;  %440 = vperm.xlu1 %1155, %v370_v44  }
  0x3e   :  { %445 = vperm.xlu0 %1154, %v371_v45   ;;  %450 = vperm.xlu1 %1155, %v372_v46  }
  0x42   :  { %656 = vperm.xlu0 %1154, %v638_v47   ;;  %661 = vperm.xlu1 %1155, %v639_v48  }
  0x46   :  { %666 = vperm.xlu0 %1154, %v640_v49   ;;  %671 = vperm.xlu1 %1155, %v641_v50  }
  0x4a   :  { %676 = vperm.xlu0 %1154, %v642_v51   ;;  %681 = vperm.xlu1 %1155, %v643_v52  }
  0x4e   :  { %686 = vperm.xlu0 %1154, %v644_v53   ;;  %691 = vperm.xlu1 %1155, %v645_v54  }
  0x52   :  { %696 = vperm.xlu0 %1154, %v646_v55   ;;  %701 = vperm.xlu1 %1155, %v647_v56  }
  0x56   :  { %706 = vperm.xlu0 %1154, %v648_v57   ;;  %711 = vperm.xlu1 %1155, %v649_v58  }
  0x5a   :  { %716 = vperm.xlu0 %1154, %v650_v59   ;;  %721 = vperm.xlu1 %1155, %v651_v60  }
  0x5e   :  { %726 = vperm.xlu0 %1154, %v652_v61   ;;  %731 = vperm.xlu1 %1155, %v653_v62  }
  0x62   :  { %907 = vperm.xlu0 %1154, %v904_v63  }
  0x81   :  { %v71_v1 = vpop.permute.xlu0 %70  ;;  %v81_v2 = vpop.permute.xlu1 %80 }
  0x85   :  { %v76_v3 = vpop.permute.xlu0 %75  ;;  %v86_v4 = vpop.permute.xlu1 %85 }
  0x89   :  { %v91_v5 = vpop.permute.xlu0 %90  ;;  %v96_v6 = vpop.permute.xlu1 %95 }
  0x8d   :  { %v101_v7 = vpop.permute.xlu0 %100  ;;  %v106_v11 = vpop.permute.xlu1 %105 }
  0x91   :  { %v111_v19 = vpop.permute.xlu0 %110  ;;  %v116_v23 = vpop.permute.xlu1 %115 }
  0x95   :  { %v121_v32 = vpop.permute.xlu0 %120  ;;  %v126_v36 = vpop.permute.xlu1 %125 }
  0x99   :  { %v131_v44 = vpop.permute.xlu0 %130  ;;  %v136_v49 = vpop.permute.xlu1 %135 }
  0x9d   :  { %v141_v56 = vpop.permute.xlu0 %140  ;;  %v146_v61 = vpop.permute.xlu1 %145 }
  0xde   :  { %v1051_v8 = vpop.f32.mrb[0].mxu0 }
  0xdf   :  { %v263_v9 = vadd.f32 %v1051_v8, %v81_v2  ;;  %v254_v10 = vpop.f32.mrb[1].mxu0 }
  0xe0   :  { %v255_v12 = vadd.f32 %v254_v10, %v71_v1  ;;  %v1052_v13 = vpop.f32.mrb[2].mxu0  ;;  %v1166_v10 = vld [vmem:[%s1516_s3 + $0x10] sm:$0xff]  }
  0xe1   :  { %v266_v14 = vadd.f32 %v1052_v13, %v86_v4  ;;  %v257_v15 = vpop.f32.mrb[3].mxu0  ;;  %v319_v17 = vmax.f32 %v263_v9, 0.0  ;;  %v1165_v9 = vld [vmem:[%s1516_s3 + $0x8] sm:$0xff]  }
  0xe2   :  { %v258_v16 = vadd.f32 %v257_v15, %v76_v3  ;;  %v317_v20 = vmax.f32 %v255_v12, 0.0  ;;  %v1168_v12 = vld [vmem:[%s1516_s3 + $0x20] sm:$0xff]   ;;  %v1169_v13 = vld [vmem:[%s1516_s3 + $0x28] sm:$0xff]   ;;  %v1171_v15 = vld [vmem:[%s1516_s3 + $0x38] sm:$0xff]  }
  0xe3   :  { %v320_v18 = vmax.f32 %v266_v14, 0.0  ;;  %v1170_v14 = vld [vmem:[%s1516_s3 + $0x30] sm:$0xff]  }
  0xe4   :  { %v318_v21 = vmax.f32 %v258_v16, 0.0  ;;  %v1172_v16 = vld [vmem:[%s1518_s5] sm:$0xff]  }
  0xe5   :  { %v350_v22 = vpack.c.bf16 %v320_v18, %v319_v17  ;;  %1113 = vmatprep.mubr.bf16.mxu0 %v1172_v16  ;;  %v376_v17 = vpop.permute.xlu0 %375  ;;  %v381_v18 = vpop.permute.xlu1 %380 }
  0xe6   :  { %v1055_v24 = vpop.f32.mrb[4].mxu0  ;;  %v349_v25 = vpack.c.bf16 %v318_v21, %v317_v20 }
  0xe7   :  { %v279_v26 = vadd.f32 %v1055_v24, %v101_v7  ;;  %v270_v27 = vpop.f32.mrb[5].mxu0 }
  0xe8   :  { %v271_v28 = vadd.f32 %v270_v27, %v91_v5  ;;  %v1056_v29 = vpop.f32.mrb[6].mxu0  ;;  %1065 = vmatprep.subr.bf16.mxu1 %v349_v25 }
  0xe9   :  { %v282_v30 = vadd.f32 %v1056_v29, %v106_v11  ;;  %v273_v31 = vpop.f32.mrb[7].mxu0  ;;  %1066 = vmatpush3.bf16.msra.mxu1 %v349_v25  ;;  %v323_v34 = vmax.f32 %v279_v26, 0.0  ;;  %v1167_v11 = vld [vmem:[%s1516_s3 + $0x18] sm:$0xff]   ;;  %v391_v20 = vpop.permute.xlu1 %390 }
  0xea   :  { %v274_v33 = vadd.f32 %v273_v31, %v96_v6  ;;  %1067 = vmatprep.subr.bf16.mxu1 %v350_v22  ;;  %v321_v37 = vmax.f32 %v271_v28, 0.0 }
  0xeb   :  { %v324_v35 = vmax.f32 %v282_v30, 0.0 }
  0xec   :  { %v322_v38 = vmax.f32 %v274_v33, 0.0 }
  0xed   :  { %v352_v39 = vpack.c.bf16 %v324_v35, %v323_v34  ;;  %1068 = vmatpush3.bf16.msra.mxu1 %v350_v22  ;;  %v401_v22 = vpop.permute.xlu1 %400 }
  0xee   :  { %v351_v40 = vpack.c.bf16 %v322_v38, %v321_v37  ;;  %v1059_v41 = vpop.f32.mrb[8].mxu0 }
  0xef   :  { %v295_v42 = vadd.f32 %v1059_v41, %v121_v32  ;;  %v286_v43 = vpop.f32.mrb[9].mxu0 }
  0xf0   :  { %v287_v45 = vadd.f32 %v286_v43, %v111_v19  ;;  %v1060_v46 = vpop.f32.mrb[10].mxu0  ;;  %1069 = vmatprep.subr.bf16.mxu1 %v351_v40  ;;  %v386_v19 = vpop.permute.xlu0 %385 }
  0xf1   :  { %v298_v47 = vadd.f32 %v1060_v46, %v126_v36  ;;  %v289_v48 = vpop.f32.mrb[11].mxu0  ;;  %1070 = vmatpush3.bf16.msra.mxu1 %v351_v40  ;;  %v327_v51 = vmax.f32 %v295_v42, 0.0  ;;  %v411_v27 = vpop.permute.xlu1 %410 }
  0xf2   :  { %v290_v50 = vadd.f32 %v289_v48, %v116_v23  ;;  %1071 = vmatprep.subr.bf16.mxu1 %v352_v39  ;;  %v325_v53 = vmax.f32 %v287_v45, 0.0 }
  0xf3   :  { %v328_v52 = vmax.f32 %v298_v47, 0.0 }
  0xf4   :  { %v326_v54 = vmax.f32 %v290_v50, 0.0  ;;  %v396_v21 = vpop.permute.xlu0 %395 }
  0xf5   :  { %v354_v55 = vpack.c.bf16 %v328_v52, %v327_v51  ;;  %1072 = vmatpush3.bf16.msra.mxu1 %v352_v39  ;;  %v421_v39 = vpop.permute.xlu1 %420 }
  0xf6   :  { %v353_v57 = vpack.c.bf16 %v326_v54, %v325_v53  ;;  %v1063_v58 = vpop.f32.mrb[12].mxu0 }
  0xf7   :  { %v311_v59 = vadd.f32 %v1063_v58, %v141_v56  ;;  %v302_v60 = vpop.f32.mrb[13].mxu0 }
  0xf8   :  { %v303_v62 = vadd.f32 %v302_v60, %v131_v44  ;;  %v1064_v63 = vpop.f32.mrb[14].mxu0  ;;  %1073 = vmatprep.subr.bf16.mxu1 %v353_v57  ;;  %v406_v23 = vpop.permute.xlu0 %405 }
  0xf9   :  { %v314_v0 = vadd.f32 %v1064_v63, %v146_v61  ;;  %v305_v1 = vpop.f32.mrb[15].mxu0  ;;  %1074 = vmatpush3.bf16.msra.mxu1 %v353_v57  ;;  %v331_v3 = vmax.f32 %v311_v59, 0.0  ;;  %v431_v52 = vpop.permute.xlu1 %430 }
  0xfa   :  { %v306_v2 = vadd.f32 %v305_v1, %v136_v49  ;;  %1075 = vmatprep.subr.bf16.mxu1 %v354_v55  ;;  %v329_v5 = vmax.f32 %v303_v62, 0.0 }
  0xfb   :  { %v332_v4 = vmax.f32 %v314_v0, 0.0 }
  0xfc   :  { %v330_v6 = vmax.f32 %v306_v2, 0.0  ;;  %v416_v35 = vpop.permute.xlu0 %415 }
  0xfd   :  { %v356_v7 = vpack.c.bf16 %v332_v4, %v331_v3  ;;  %1076 = vmatpush3.bf16.msra.mxu1 %v354_v55  ;;  %v441_v1 = vpop.permute.xlu1 %440 }
  0xfe   :  { %v355_v8 = vpack.c.bf16 %v330_v6, %v329_v5 }
 0x100   :  { %1077 = vmatprep.subr.bf16.mxu1 %v355_v8  ;;  %v426_v48 = vpop.permute.xlu0 %425 }
 0x101   :  { %1078 = vmatpush3.bf16.msra.mxu1 %v355_v8 }
 0x102   :  { %1079 = vmatprep.subr.bf16.mxu1 %v356_v7 }
 0x104   :  { %v436_v60 = vpop.permute.xlu0 %435 }
 0x105   :  { %1080 = vmatpush3.bf16.msra.mxu1 %v356_v7 }
 0x108   :  { %1082 = vmatmul.mubr.bf16.vlgmr.msra.gmra.mrb[0].mxu1 %v1165_v9  ;;  %v446_v8 = vpop.permute.xlu0 %445 }
 0x109   :  { %1085 = vmatprep.mubr.bf16.mxu1 %v1166_v10 }
 0x110   :  { %1086 = vmatmul.mubr.bf16.gmra.mrb[4].mxu1 %v1167_v11 }
 0x111   :  { %1089 = vmatprep.mubr.bf16.mxu1 %v1168_v12 }
 0x118   :  { %1090 = vmatmul.mubr.bf16.gmra.mrb[8].mxu1 %v1169_v13  ;;  %v451_v13 = vpop.permute.xlu1 %450 }
 0x119   :  { %1093 = vmatprep.mubr.bf16.mxu1 %v1170_v14 }
 0x120   :  { %1094 = vmatmul.mubr.bf16.gmra.mrb[12].mxu1 %v1171_v15 }
 0x1db   :  { %v1083_v24 = vpop.f32.mrb[0].mxu1 }
 0x1dc   :  { %v544_v25 = vadd.f32 %v1083_v24, %v386_v19  ;;  %v535_v26 = vpop.f32.mrb[1].mxu1 }
 0x1dd   :  { %v536_v28 = vadd.f32 %v535_v26, %v376_v17  ;;  %v1084_v29 = vpop.f32.mrb[2].mxu1  ;;  %v1174_v26 = vld [vmem:[%s1518_s5 + $0x10] sm:$0xff]  }
 0x1de   :  { %v547_v30 = vadd.f32 %v1084_v29, %v391_v20  ;;  %v538_v31 = vpop.f32.mrb[3].mxu1  ;;  %v600_v33 = vmax.f32 %v544_v25, 0.0  ;;  %v1173_v25 = vld [vmem:[%s1518_s5 + $0x8] sm:$0xff]  }
 0x1df   :  { %v539_v32 = vadd.f32 %v538_v31, %v381_v18  ;;  %v598_v36 = vmax.f32 %v536_v28, 0.0  ;;  %v1176_v28 = vld [vmem:[%s1518_s5 + $0x20] sm:$0xff]   ;;  %v1177_v29 = vld [vmem:[%s1518_s5 + $0x28] sm:$0xff]   ;;  %v1179_v31 = vld [vmem:[%s1518_s5 + $0x38] sm:$0xff]  }
 0x1e0   :  { %v601_v34 = vmax.f32 %v547_v30, 0.0  ;;  %v1178_v30 = vld [vmem:[%s1518_s5 + $0x30] sm:$0xff]  }
 0x1e1   :  { %v599_v37 = vmax.f32 %v539_v32, 0.0  ;;  %v1206_v32 = vmov 0.0  }
 0x1e2   :  { %v631_v38 = vpack.c.bf16 %v601_v34, %v600_v33  ;;  %1129 = vmatprep.subr.bf16.mxu1 %v1206_v32  ;;  %1145 = vmatprep.mubr.msk.bf16.mxu1 %vm1207_vm3, %v1206_v32  ;;  %v657_v33 = vpop.permute.xlu0 %656  ;;  %v662_v34 = vpop.permute.xlu1 %661 }
 0x1e3   :  { %v630_v40 = vpack.c.bf16 %v599_v37, %v598_v36  ;;  %v1087_v41 = vpop.f32.mrb[4].mxu1 }
 0x1e4   :  { %v560_v42 = vadd.f32 %v1087_v41, %v406_v23  ;;  %v551_v43 = vpop.f32.mrb[5].mxu1 }
 0x1e5   :  { %v552_v44 = vadd.f32 %v551_v43, %v396_v21  ;;  %v1088_v45 = vpop.f32.mrb[6].mxu1  ;;  %1097 = vmatprep.subr.bf16.mxu0 %v630_v40 }
 0x1e6   :  { %v563_v46 = vadd.f32 %v1088_v45, %v411_v27  ;;  %v554_v47 = vpop.f32.mrb[7].mxu1  ;;  %1098 = vmatpush3.bf16.msra.mxu0 %v630_v40  ;;  %v604_v50 = vmax.f32 %v560_v42, 0.0  ;;  %v1175_v27 = vld [vmem:[%s1518_s5 + $0x18] sm:$0xff]   ;;  %v672_v36 = vpop.permute.xlu1 %671 }
 0x1e7   :  { %v555_v49 = vadd.f32 %v554_v47, %v401_v22  ;;  %1099 = vmatprep.subr.bf16.mxu0 %v631_v38  ;;  %v602_v53 = vmax.f32 %v552_v44, 0.0 }
 0x1e8   :  { %v605_v51 = vmax.f32 %v563_v46, 0.0 }
 0x1e9   :  { %v603_v54 = vmax.f32 %v555_v49, 0.0 }
 0x1ea   :  { %v633_v55 = vpack.c.bf16 %v605_v51, %v604_v50  ;;  %1100 = vmatpush3.bf16.msra.mxu0 %v631_v38  ;;  %v682_v38 = vpop.permute.xlu1 %681 }
 0x1eb   :  { %v632_v56 = vpack.c.bf16 %v603_v54, %v602_v53  ;;  %v1091_v57 = vpop.f32.mrb[8].mxu1 }
 0x1ec   :  { %v576_v58 = vadd.f32 %v1091_v57, %v426_v48  ;;  %v567_v59 = vpop.f32.mrb[9].mxu1 }
 0x1ed   :  { %v568_v61 = vadd.f32 %v567_v59, %v416_v35  ;;  %v1092_v62 = vpop.f32.mrb[10].mxu1  ;;  %1101 = vmatprep.subr.bf16.mxu0 %v632_v56  ;;  %v667_v35 = vpop.permute.xlu0 %666 }
 0x1ee   :  { %v579_v63 = vadd.f32 %v1092_v62, %v431_v52  ;;  %v570_v0 = vpop.f32.mrb[11].mxu1  ;;  %1102 = vmatpush3.bf16.msra.mxu0 %v632_v56  ;;  %v608_v3 = vmax.f32 %v576_v58, 0.0  ;;  %v692_v43 = vpop.permute.xlu1 %691 }
 0x1ef   :  { %v571_v2 = vadd.f32 %v570_v0, %v421_v39  ;;  %1103 = vmatprep.subr.bf16.mxu0 %v633_v55  ;;  %v606_v5 = vmax.f32 %v568_v61, 0.0 }
 0x1f0   :  { %v609_v4 = vmax.f32 %v579_v63, 0.0 }
 0x1f1   :  { %v607_v6 = vmax.f32 %v571_v2, 0.0  ;;  %v677_v37 = vpop.permute.xlu0 %676 }
 0x1f2   :  { %v635_v7 = vpack.c.bf16 %v609_v4, %v608_v3  ;;  %1104 = vmatpush3.bf16.msra.mxu0 %v633_v55  ;;  %v702_v55 = vpop.permute.xlu1 %701 }
 0x1f3   :  { %v634_v9 = vpack.c.bf16 %v607_v6, %v606_v5  ;;  %v1095_v10 = vpop.f32.mrb[12].mxu1 }
 0x1f4   :  { %v592_v11 = vadd.f32 %v1095_v10, %v446_v8  ;;  %v583_v12 = vpop.f32.mrb[13].mxu1 }
 0x1f5   :  { %v584_v14 = vadd.f32 %v583_v12, %v436_v60  ;;  %v1096_v15 = vpop.f32.mrb[14].mxu1  ;;  %1105 = vmatprep.subr.bf16.mxu0 %v634_v9  ;;  %v687_v39 = vpop.permute.xlu0 %686 }
 0x1f6   :  { %v595_v16 = vadd.f32 %v1096_v15, %v451_v13  ;;  %v586_v17 = vpop.f32.mrb[15].mxu1  ;;  %1106 = vmatpush3.bf16.msra.mxu0 %v634_v9  ;;  %v612_v19 = vmax.f32 %v592_v11, 0.0  ;;  %v712_v4 = vpop.permute.xlu1 %711 }
 0x1f7   :  { %v587_v18 = vadd.f32 %v586_v17, %v441_v1  ;;  %1107 = vmatprep.subr.bf16.mxu0 %v635_v7  ;;  %v610_v21 = vmax.f32 %v584_v14, 0.0 }
 0x1f8   :  { %v613_v20 = vmax.f32 %v595_v16, 0.0 }
 0x1f9   :  { %v611_v22 = vmax.f32 %v587_v18, 0.0  ;;  %v697_v51 = vpop.permute.xlu0 %696 }
 0x1fa   :  { %v637_v23 = vpack.c.bf16 %v613_v20, %v612_v19  ;;  %1108 = vmatpush3.bf16.msra.mxu0 %v635_v7  ;;  %v722_v17 = vpop.permute.xlu1 %721 }
 0x1fb   :  { %v636_v24 = vpack.c.bf16 %v611_v22, %v610_v21 }
 0x1fd   :  { %1109 = vmatprep.subr.bf16.mxu0 %v636_v24  ;;  %v707_v0 = vpop.permute.xlu0 %706 }
 0x1fe   :  { %1110 = vmatpush3.bf16.msra.mxu0 %v636_v24 }
 0x1ff   :  { %1111 = vmatprep.subr.bf16.mxu0 %v637_v23 }
 0x201   :  { %v717_v12 = vpop.permute.xlu0 %716 }
 0x202   :  { %1112 = vmatpush3.bf16.msra.mxu0 %v637_v23 }
 0x205   :  { %1114 = vmatmul.mubr.bf16.vlgmr.msra.gmra.mrb[16].mxu0 %v1173_v25  ;;  %v727_v24 = vpop.permute.xlu0 %726 }
 0x206   :  { %1117 = vmatprep.mubr.bf16.mxu0 %v1174_v26 }
 0x20d   :  { %1118 = vmatmul.mubr.bf16.gmra.mrb[20].mxu0 %v1175_v27 }
 0x20e   :  { %1121 = vmatprep.mubr.bf16.mxu0 %v1176_v28 }
 0x215   :  { %1122 = vmatmul.mubr.bf16.gmra.mrb[24].mxu0 %v1177_v29  ;;  %v732_v29 = vpop.permute.xlu1 %731 }
 0x216   :  { %1125 = vmatprep.mubr.bf16.mxu0 %v1178_v30 }
 0x21d   :  { %1126 = vmatmul.mubr.bf16.gmra.mrb[28].mxu0 %v1179_v31 }
 0x2d8   :  { %v1115_v40 = vpop.f32.mrb[16].mxu0 }
 0x2d9   :  { %v825_v41 = vadd.f32 %v1115_v40, %v667_v35  ;;  %v816_v42 = vpop.f32.mrb[17].mxu0 }
 0x2da   :  { %v817_v44 = vadd.f32 %v816_v42, %v657_v33  ;;  %v1116_v45 = vpop.f32.mrb[18].mxu0  ;;  %v895_v42 = vld [vmem:[%s1520_s7] sm:$0x1] }
 0x2db   :  { %v828_v46 = vadd.f32 %v1116_v45, %v672_v36  ;;  %v819_v47 = vpop.f32.mrb[19].mxu0  ;;  %v881_v49 = vmax.f32 %v825_v41, 0.0 }
 0x2dc   :  { %v820_v48 = vadd.f32 %v819_v47, %v662_v34  ;;  %v879_v52 = vmax.f32 %v817_v44, 0.0 }
 0x2dd   :  { %v882_v50 = vmax.f32 %v828_v46, 0.0 }
 0x2de   :  { %v880_v53 = vmax.f32 %v820_v48, 0.0 }
 0x2df   :  { %v897_v54 = vpack.c.bf16 %v882_v50, %v881_v49 }
 0x2e0   :  { %v896_v56 = vpack.c.bf16 %v880_v53, %v879_v52  ;;  %v1119_v57 = vpop.f32.mrb[20].mxu0 }
 0x2e1   :  { %v841_v58 = vadd.f32 %v1119_v57, %v687_v39  ;;  %v832_v59 = vpop.f32.mrb[21].mxu0 }
 0x2e2   :  { %v833_v60 = vadd.f32 %v832_v59, %v677_v37  ;;  %v1120_v61 = vpop.f32.mrb[22].mxu0  ;;  %1130 = vmatpush3.bf16.msra.mxu1 %v896_v56 }
 0x2e3   :  { %v844_v62 = vadd.f32 %v1120_v61, %v692_v43  ;;  %v835_v63 = vpop.f32.mrb[23].mxu0  ;;  %1131 = vmatprep.subr.bf16.mxu1 %v1206_v32  ;;  %v885_v2 = vmax.f32 %v841_v58, 0.0  ;;  %v908_v43 = vpop.permute.xlu0 %907 }
 0x2e4   :  { %v836_v1 = vadd.f32 %v835_v63, %v682_v38  ;;  %v883_v5 = vmax.f32 %v833_v60, 0.0 }
 0x2e5   :  { %v886_v3 = vmax.f32 %v844_v62, 0.0 }
 0x2e6   :  { %v884_v6 = vmax.f32 %v836_v1, 0.0  ;;  %1132 = vmatpush3.bf16.msra.mxu1 %v897_v54 }
 0x2e7   :  { %v899_v7 = vpack.c.bf16 %v886_v3, %v885_v2  ;;  %1133 = vmatprep.subr.bf16.mxu1 %v1206_v32 }
 0x2e8   :  { %v898_v8 = vpack.c.bf16 %v884_v6, %v883_v5  ;;  %v1123_v9 = vpop.f32.mrb[24].mxu0 }
 0x2e9   :  { %v857_v10 = vadd.f32 %v1123_v9, %v707_v0  ;;  %v848_v11 = vpop.f32.mrb[25].mxu0 }
 0x2ea   :  { %v849_v13 = vadd.f32 %v848_v11, %v697_v51  ;;  %v1124_v14 = vpop.f32.mrb[26].mxu0  ;;  %1134 = vmatpush3.bf16.msra.mxu1 %v898_v8 }
 0x2eb   :  { %v860_v15 = vadd.f32 %v1124_v14, %v712_v4  ;;  %v851_v16 = vpop.f32.mrb[27].mxu0  ;;  %1135 = vmatprep.subr.bf16.mxu1 %v1206_v32  ;;  %v889_v19 = vmax.f32 %v857_v10, 0.0 }
 0x2ec   :  { %v852_v18 = vadd.f32 %v851_v16, %v702_v55  ;;  %v887_v21 = vmax.f32 %v849_v13, 0.0 }
 0x2ed   :  { %v890_v20 = vmax.f32 %v860_v15, 0.0 }
 0x2ee   :  { %v888_v22 = vmax.f32 %v852_v18, 0.0  ;;  %1136 = vmatpush3.bf16.msra.mxu1 %v899_v7 }
 0x2ef   :  { %v901_v23 = vpack.c.bf16 %v890_v20, %v889_v19  ;;  %1137 = vmatprep.subr.bf16.mxu1 %v1206_v32 }
 0x2f0   :  { %v900_v25 = vpack.c.bf16 %v888_v22, %v887_v21  ;;  %v1127_v26 = vpop.f32.mrb[28].mxu0 }
 0x2f1   :  { %v873_v27 = vadd.f32 %v1127_v26, %v727_v24  ;;  %v864_v28 = vpop.f32.mrb[29].mxu0 }
 0x2f2   :  { %v865_v30 = vadd.f32 %v864_v28, %v717_v12  ;;  %v1128_v31 = vpop.f32.mrb[30].mxu0  ;;  %1138 = vmatpush3.bf16.msra.mxu1 %v900_v25 }
 0x2f3   :  { %v876_v33 = vadd.f32 %v1128_v31, %v732_v29  ;;  %v867_v34 = vpop.f32.mrb[31].mxu0  ;;  %1139 = vmatprep.subr.bf16.mxu1 %v1206_v32  ;;  %v893_v36 = vmax.f32 %v873_v27, 0.0 }
 0x2f4   :  { %v868_v35 = vadd.f32 %v867_v34, %v722_v17  ;;  %v891_v38 = vmax.f32 %v865_v30, 0.0 }
 0x2f5   :  { %v894_v37 = vmax.f32 %v876_v33, 0.0 }
 0x2f6   :  { %v892_v39 = vmax.f32 %v868_v35, 0.0  ;;  %1140 = vmatpush3.bf16.msra.mxu1 %v901_v23 }
 0x2f7   :  { %v903_v40 = vpack.c.bf16 %v894_v37, %v893_v36  ;;  %1141 = vmatprep.subr.bf16.mxu1 %v1206_v32 }
 0x2f8   :  { %v902_v41 = vpack.c.bf16 %v892_v39, %v891_v38 }
 0x2fa   :  { %1142 = vmatpush3.bf16.msra.mxu1 %v902_v41 }
 0x2fb   :  { %1143 = vmatprep.subr.bf16.mxu1 %v1206_v32 }
 0x2fe   :  { %1144 = vmatpush3.bf16.msra.mxu1 %v903_v40 }
 0x301   :  { %1146 = vmatmul.mubr.bf16.vlgmr.msra.gmra.mrb[16].mxu1 %v895_v42 }
 0x3d4   :  { %v944_v44 = vpop.f32.mrb[16].mxu1 }
 0x3d5   :  { %v945_v45 = vadd.f32 %v944_v44, %v908_v43  ;;  %v1147_v46 = vpop.f32.mrb[17].mxu1 }
 0x3d6   :  { %v947_v47 = vpop.f32.mrb[18].mxu1 }
 0x3d7   :  { %950 = vst [vmem:[#allocation2] sm:$0x3] %v945_v45  ;;  %v1148_v48 = vpop.f32.mrb[19].mxu1 }
 0x3d8   :  { %1191 = shalt.err (!%p1188_p4)
}
 0x3d9   :  { %s1192_s14 = scalar_lea.hbm %s1522_s9, 32 }
 0x3da   :  { %p1193_p5 = scmp.ne.s32.totalorder %s1522_s9, %s1192_s14  ;;  %p1196_p6 = scmp.lt.u32.totalorder %s1192_s14, %s1522_s9 }
 0x3dc   :  { %p1198_p7 = pnand %p1196_p6, %p1193_p5 }
 0x3de   :  { %1201 = shalt.err (!%p1198_p7)
}
 0x3df   :  { %960 = dma.vmem_to_hbm [thread:$0]  %s958_s11, 32, %s1522_s9, [#allocation3]  }
 0x3e0   :  { %1202 = dma.done.wait [#allocation3], 32  }
 0x3e1   :  { %1203 = vsyncadd [#allocation3], 4294967264 }
 0x3e2   :  { %964 = vsyncpa [#allocation3], 1 }

</bundles_post_ra>
